<compile_context>
chip_gen: v7x
topology: tpu7x:2x2x1
jax: 0.10.0
libtpu: 0.0.40
codegen_flags: <defaults>
</compile_context>

<pallas_src>
import functools

import jax
import jax.numpy as jnp
from jax.experimental import pallas as pl
from jax.experimental.pallas import tpu as pltpu

EPS = 1e-5
LANE = 128

# Matmul operand dtype. bf16 feeds the MXU at full rate on v6e/v7x and halves
# HBM/VMEM traffic; all normalization statistics stay in f32.
# On v5e you may prefer jnp.float32 here.
MATMUL_DTYPE = jnp.bfloat16


# ---------------------------------------------------------------------------
# helpers
# ---------------------------------------------------------------------------

def _round_up(x, m):
    return (x + m - 1) // m * m


def _pad_to(a, shape):
    pads = [(0, s - d) for d, s in zip(a.shape, shape)]
    return jnp.pad(a, pads)


def _resident_spec(shape):
    """BlockSpec whose block == whole array and never changes -> stays in VMEM."""
    zeros = (0,) * len(shape)
    return pl.BlockSpec(shape, lambda i: zeros)


# ---------------------------------------------------------------------------
# Pallas kernels
# ---------------------------------------------------------------------------

def bn_stats_kernel(x_ref, w_ref, mean_ref, rstd_ref, sum_sc, sq_sc, *, n_real):
    """Pass 1: BatchNorm1d batch statistics of the encoder output.

    Accumulates per-channel sum / sum-of-squares across node tiles (reduction
    grid axis, 'arbitrary'); zero-padded rows contribute nothing, so dividing
    by the real node count gives exact batch statistics.
    """
    i = pl.program_id(0)

    @pl.when(i == 0)
    def _():
        sum_sc[...] = jnp.zeros_like(sum_sc)
        sq_sc[...] = jnp.zeros_like(sq_sc)

    h = jnp.dot(x_ref[...], w_ref[...], preferred_element_type=jnp.float32)
    sum_sc[...] += jnp.sum(h, axis=0, keepdims=True)
    sq_sc[...] += jnp.sum(h * h, axis=0, keepdims=True)

    @pl.when(i == pl.num_programs(0) - 1)
    def _():
        inv_n = jnp.float32(1.0 / n_real)
        mu = sum_sc[...] * inv_n
        var = jnp.maximum(sq_sc[...] * inv_n - mu * mu, 0.0)  # biased, like torch BN
        mean_ref[...] = mu
        rstd_ref[...] = jax.lax.rsqrt(var + EPS)


def fused_forward_kernel(x_ref, enc_w_ref, mean_ref, rstd_ref, bn_g_ref, bn_b_ref,
                         ln_g_ref, ln_b_ref, w1_ref, b1_ref, w2_ref, b2_ref,
                         out_g_ref, out_b_ref, head_w_ref, head_b_ref, o_ref,
                         *, n_layers, d_real):
    """Pass 2: encoder + BatchNorm + L CKG blocks + head, fused per node tile.

    Channel dims are zero-padded to 128 lanes; LN gamma/beta (and BN gamma/beta)
    are zero in the padded columns, so padded channels stay exactly zero through
    every layer.  LN statistics therefore use sum/d_real (padded zeros do not
    contribute) with var = E[h^2] - mu^2, keeping them correct over the real
    channels only.
    """
    mm = MATMUL_DTYPE
    inv_d = jnp.float32(1.0 / d_real)

    # FeatureEncoder: Linear (no bias) + BatchNorm1d with precomputed stats.
    h = jnp.dot(x_ref[...], enc_w_ref[...], preferred_element_type=jnp.float32)
    h = (h - mean_ref[...]) * rstd_ref[...] * bn_g_ref[...] + bn_b_ref[...]

    # Stem / pre_backbone_norm: Identity under default cfg.

    # Backbone: static unroll over the (small) layer count; per-layer params
    # are read once per layer from the stacked, VMEM-resident weight arrays.
    for l in range(n_layers):
        g = ln_g_ref[l]
        b = ln_b_ref[l]
        mu = jnp.sum(h, axis=-1, keepdims=True) * inv_d
        var = jnp.maximum(jnp.sum(h * h, axis=-1, keepdims=True) * inv_d - mu * mu, 0.0)
        hn = (h - mu) * jax.lax.rsqrt(var + EPS) * g + b
        z = jnp.dot(hn.astype(mm), w1_ref[l], preferred_element_type=jnp.float32) + b1_ref[l]
        z = jnp.maximum(z, 0.0)                      # cfg.gnn.act = 'relu'
        z = jnp.dot(z.astype(mm), w2_ref[l], preferred_element_type=jnp.float32) + b2_ref[l]
        h = h + z                                    # residual=True

    # out_norm on the last layer (out_norm = (l == layers-1)).
    mu = jnp.sum(h, axis=-1, keepdims=True) * inv_d
    var = jnp.maximum(jnp.sum(h * h, axis=-1, keepdims=True) * inv_d - mu * mu, 0.0)
    h = (h - mu) * jax.lax.rsqrt(var + EPS) * out_g_ref[...] + out_b_ref[...]

    # post_backbone_norm: Identity.  post_mp GNN head: Linear.
    o_ref[...] = (jnp.dot(h.astype(mm), head_w_ref[...],
                          preferred_element_type=jnp.float32)
                  + head_b_ref[...]).astype(o_ref.dtype)


# ---------------------------------------------------------------------------
# Wrapper
# ---------------------------------------------------------------------------

def _prepare_padded_params(params, dpi, dp, dfp, dpo):
    """Zero-pad to lane-dense shapes, stack per-layer params, cast matmul
    weights to MATMUL_DTYPE.  Gamma/beta pads are zero so padded channels stay
    exactly zero through the network."""
    layers = params["layers"]
    return {
        "enc_w": _pad_to(params["enc_w"], (dpi, dp)).astype(MATMUL_DTYPE),
        "bn_g": _pad_to(params["enc_bn_g"], (1, dp)),
        "bn_b": _pad_to(params["enc_bn_b"], (1, dp)),
        "ln_g": jnp.stack([_pad_to(lp["ln_g"], (1, dp)) for lp in layers]),
        "ln_b": jnp.stack([_pad_to(lp["ln_b"], (1, dp)) for lp in layers]),
        "w1": jnp.stack([_pad_to(lp["w1"], (dp, dfp)) for lp in layers]).astype(MATMUL_DTYPE),
        "b1": jnp.stack([_pad_to(lp["b1"], (1, dfp)) for lp in layers]),
        "w2": jnp.stack([_pad_to(lp["w2"], (dfp, dp)) for lp in layers]).astype(MATMUL_DTYPE),
        "b2": jnp.stack([_pad_to(lp["b2"], (1, dp)) for lp in layers]),
        "out_g": _pad_to(layers[-1]["out_g"], (1, dp)),
        "out_b": _pad_to(layers[-1]["out_b"], (1, dp)),
        "head_w": _pad_to(params["head_w"], (dp, dpo)).astype(MATMUL_DTYPE),
        "head_b": _pad_to(params["head_b"], (1, dpo)),
    }


def ckgraphconvnet_forward(x, params):
    n, dim_in = x.shape
    dim_hidden = params["enc_w"].shape[1]
    d_ff = params["layers"][0]["w1"].shape[1]
    dim_out = params["head_w"].shape[1]
    n_layers = len(params["layers"])

    dpi = _round_up(dim_in, LANE)
    dp = _round_up(dim_hidden, LANE)
    dfp = _round_up(d_ff, LANE)
    dpo = _round_up(dim_out, LANE)

    # Node-tile size: 512 rows gives good HBM<->VMEM pipelining at realistic N;
    # small graphs collapse to a single lane-aligned tile.  Per-tile VMEM use
    # (double-buffered x/out tiles + resident weights) is well under the 32 MiB
    # limit set below, which is safe on v5e/v6e/v7x.
    tm = 512 if n >= 512 else _round_up(n, LANE)
    n_pad = _round_up(n, tm)
    grid = (n_pad // tm,)

    pp = _prepare_padded_params(params, dpi, dp, dfp, dpo)
    x_pad = _pad_to(x, (n_pad, dpi)).astype(MATMUL_DTYPE)

    vmem_limit = 32 * 1024 * 1024
    itemsize = jnp.dtype(MATMUL_DTYPE).itemsize

    # ---- Pass 1: BatchNorm batch statistics (reduction over node tiles) ----
    mean, rstd = pl.pallas_call(
        functools.partial(bn_stats_kernel, n_real=n),
        grid=grid,
        in_specs=[
            pl.BlockSpec((tm, dpi), lambda i: (i, 0)),
            _resident_spec((dpi, dp)),
        ],
        out_specs=[
            pl.BlockSpec((1, dp), lambda i: (0, 0)),
            pl.BlockSpec((1, dp), lambda i: (0, 0)),
        ],
        out_shape=[
            jax.ShapeDtypeStruct((1, dp), jnp.float32),
            jax.ShapeDtypeStruct((1, dp), jnp.float32),
        ],
        scratch_shapes=[
            pltpu.VMEM((1, dp), jnp.float32),
            pltpu.VMEM((1, dp), jnp.float32),
        ],
        compiler_params=pltpu.CompilerParams(
            dimension_semantics=("arbitrary",),
            vmem_limit_bytes=vmem_limit,
        ),
        cost_estimate=pl.CostEstimate(
            flops=2 * n_pad * dpi * dp,
            transcendentals=dp,
            bytes_accessed=(n_pad * dpi + dpi * dp) * itemsize + 2 * dp * 4,
        ),
    )(x_pad, pp["enc_w"])

    # ---- Pass 2: whole forward fused, node tiles in parallel ----
    args = (x_pad, pp["enc_w"], mean, rstd, pp["bn_g"], pp["bn_b"],
            pp["ln_g"], pp["ln_b"], pp["w1"], pp["b1"], pp["w2"], pp["b2"],
            pp["out_g"], pp["out_b"], pp["head_w"], pp["head_b"])
    in_specs = [pl.BlockSpec((tm, dpi), lambda i: (i, 0))]
    in_specs += [_resident_spec(a.shape) for a in args[1:]]

    flops = 2 * n_pad * (dpi * dp + n_layers * (dp * dfp + dfp * dp) + dp * dpo)
    weight_bytes = sum(int(a.size) * a.dtype.itemsize for a in args[1:])
    out_pad = pl.pallas_call(
        functools.partial(fused_forward_kernel, n_layers=n_layers,
                          d_real=dim_hidden),
        grid=grid,
        in_specs=in_specs,
        out_specs=pl.BlockSpec((tm, dpo), lambda i: (i, 0)),
        out_shape=jax.ShapeDtypeStruct((n_pad, dpo), jnp.float32),
        compiler_params=pltpu.CompilerParams(
            dimension_semantics=("parallel",),
            vmem_limit_bytes=vmem_limit,
        ),
        cost_estimate=pl.CostEstimate(
            flops=flops,
            transcendentals=n_pad * (n_layers + 1),
            bytes_accessed=n_pad * dpi * itemsize + n_pad * dpo * 4 + weight_bytes,
        ),
    )(*args)

    return out_pad[:n, :dim_out]


# ---------------------------------------------------------------------------
# Pure-JAX reference (same bf16 matmul casts, f32 norm math)
# ---------------------------------------------------------------------------

def reference_forward(x, params):
    mm = MATMUL_DTYPE
    n_layers = len(params["layers"])
    h = jnp.dot(x.astype(mm), params["enc_w"].astype(mm),
                preferred_element_type=jnp.float32)
    mu = jnp.mean(h, axis=0, keepdims=True)
    var = jnp.mean((h - mu) ** 2, axis=0, keepdims=True)
    h = (h - mu) * jax.lax.rsqrt(var + EPS) * params["enc_bn_g"] + params["enc_bn_b"]
    for l, lp in enumerate(params["layers"]):
        mu = jnp.mean(h, axis=-1, keepdims=True)
        var = jnp.mean((h - mu) ** 2, axis=-1, keepdims=True)
        hn = (h - mu) * jax.lax.rsqrt(var + EPS) * lp["ln_g"] + lp["ln_b"]
        z = jnp.dot(hn.astype(mm), lp["w1"].astype(mm),
                    preferred_element_type=jnp.float32) + lp["b1"]
        z = jnp.maximum(z, 0.0)
        z = jnp.dot(z.astype(mm), lp["w2"].astype(mm),
                    preferred_element_type=jnp.float32) + lp["b2"]
        h = h + z
        if l == n_layers - 1:
            mu = jnp.mean(h, axis=-1, keepdims=True)
            var = jnp.mean((h - mu) ** 2, axis=-1, keepdims=True)
            h = (h - mu) * jax.lax.rsqrt(var + EPS) * lp["out_g"] + lp["out_b"]
    return jnp.dot(h.astype(mm), params["head_w"].astype(mm),
                   preferred_element_type=jnp.float32) + params["head_b"]


# ---------------------------------------------------------------------------
# Deterministic parameter init + demo
# ---------------------------------------------------------------------------

def init_params(key, dim_in, dim_hidden, dim_out, n_layers, mlp_ratio=2):
    d_ff = mlp_ratio * dim_hidden
    keys = jax.random.split(key, 2 + 2 * n_layers)
    ki = iter(keys)

    def lin(k, fan_in, fan_out):
        scale = 1.0 / jnp.sqrt(jnp.float32(fan_in))
        return jax.random.uniform(k, (fan_in, fan_out), jnp.float32, -scale, scale)

    params = {
        "enc_w": lin(next(ki), dim_in, dim_hidden),
        "enc_bn_g": jnp.ones((1, dim_hidden), jnp.float32),
        "enc_bn_b": jnp.zeros((1, dim_hidden), jnp.float32),
        "layers": [],
        "head_w": lin(next(ki), dim_hidden, dim_out),
        "head_b": jnp.zeros((1, dim_out), jnp.float32),
    }
    for _ in range(n_layers):
        params["layers"].append({
            "ln_g": jnp.ones((1, dim_hidden), jnp.float32),
            "ln_b": jnp.zeros((1, dim_hidden), jnp.float32),
            "w1": lin(next(ki), dim_hidden, d_ff),
            "b1": jnp.zeros((1, d_ff), jnp.float32),
            "w2": lin(next(ki), d_ff, dim_hidden),
            "b2": jnp.zeros((1, dim_hidden), jnp.float32),
            "out_g": jnp.ones((1, dim_hidden), jnp.float32),
            "out_b": jnp.zeros((1, dim_hidden), jnp.float32),
        })
    return params


if __name__ == "__main__":
    key = jax.random.PRNGKey(0)
    k_x, k_p = jax.random.split(key)

    N_NODES = 64        # total nodes across the batched graph
    DIM_IN = 16         # raw node feature dim
    DIM_HIDDEN = 32     # cfg.gt.dim_hidden == cfg.gnn.dim_inner
    DIM_OUT = 8         # task output dim
    N_LAYERS = 2        # cfg.gt.layers

    x = jax.random.normal(k_x, (N_NODES, DIM_IN), jnp.float32)
    params = init_params(k_p, DIM_IN, DIM_HIDDEN, DIM_OUT, N_LAYERS)

    out = ckgraphconvnet_forward(x, params)
    jax.block_until_ready(out)
    assert out.shape == (N_NODES, DIM_OUT)
    assert bool(jnp.all(jnp.isfinite(out)))

    ref = reference_forward(x, params)
    err = float(jnp.max(jnp.abs(out - ref)))
    assert err < 5e-2, f"max abs error vs reference: {err}"

    print("KERNEL_OK")
</pallas_src>

<mosaic_0001>
module attributes {stable_mosaic.version = 11 : i64} {
  func.func @bn_stats_kernel(%arg0: i32, %arg1: memref<128x128xbf16, #tpu.memory_space<vmem>>, %arg2: memref<128x128xbf16, #tpu.memory_space<vmem>>, %arg3: memref<1x128xf32, #tpu.memory_space<vmem>>, %arg4: memref<1x128xf32, #tpu.memory_space<vmem>>, %arg5: memref<1x128xf32, #tpu.memory_space<vmem>>, %arg6: memref<1x128xf32, #tpu.memory_space<vmem>>) attributes {dimension_semantics = [#tpu.dimension_semantics<arbitrary>], iteration_bounds = array<i64: 1>, scalar_prefetch = 0 : i64, scratch_operands = 2 : i64, tpu.core_type = #tpu.core_type<tc>, window_params = [{transform_indices = @transform_0, window_bounds = array<i64: 128, 128>}, {pipeline_mode = #tpu.pipeline_mode<synchronous>, transform_indices = @transform_1, window_bounds = array<i64: 128, 128>}, {pipeline_mode = #tpu.pipeline_mode<synchronous>, transform_indices = @transform_2, window_bounds = array<i64: 1, 128>}, {pipeline_mode = #tpu.pipeline_mode<synchronous>, transform_indices = @transform_3, window_bounds = array<i64: 1, 128>}]} {
    %c0_i32 = arith.constant 0 : i32
    %0 = arith.cmpi eq, %arg0, %c0_i32 : i32
    %1 = arith.extui %0 : i1 to i32
    %c0_i32_0 = arith.constant 0 : i32
    %2 = arith.cmpi ne, %1, %c0_i32_0 : i32
    scf.if %2 {
      %cst_16 = arith.constant 0.000000e+00 : f32
      %20 = vector.broadcast %cst_16 : f32 to vector<1x128xf32>
      %c0_17 = arith.constant 0 : index
      %c0_18 = arith.constant 0 : index
      %21 = vector.load %arg5[%c0_17, %c0_18] : memref<1x128xf32, #tpu.memory_space<vmem>>, vector<1x128xf32>
      tpu.vector_store %arg5[%c0_17, %c0_18], %20 {strides = array<i32>} : memref<1x128xf32, #tpu.memory_space<vmem>>, vector<1x128xf32>,
      %cst_19 = arith.constant 0.000000e+00 : f32
      %22 = vector.broadcast %cst_19 : f32 to vector<1x128xf32>
      %c0_20 = arith.constant 0 : index
      %c0_21 = arith.constant 0 : index
      %23 = vector.load %arg6[%c0_20, %c0_21] : memref<1x128xf32, #tpu.memory_space<vmem>>, vector<1x128xf32>
      tpu.vector_store %arg6[%c0_20, %c0_21], %22 {strides = array<i32>} : memref<1x128xf32, #tpu.memory_space<vmem>>, vector<1x128xf32>,
    } else {
    }
    %c0 = arith.constant 0 : index
    %c0_1 = arith.constant 0 : index
    %3 = vector.load %arg1[%c0, %c0_1] : memref<128x128xbf16, #tpu.memory_space<vmem>>, vector<128x128xbf16>
    %c0_2 = arith.constant 0 : index
    %c0_3 = arith.constant 0 : index
    %4 = vector.load %arg2[%c0_2, %c0_3] : memref<128x128xbf16, #tpu.memory_space<vmem>>, vector<128x128xbf16>
    %cst = arith.constant dense<0.000000e+00> : vector<128x128xf32>
    %5 = tpu.matmul %3, %4, %cst {dimension_numbers = #tpu.dot_dimension_numbers<[1], [0], [0], [1], [0, 0, 1, 1], [], []>} : vector<128x128xbf16>, vector<128x128xbf16>, vector<128x128xf32> -> vector<128x128xf32>
    %c0_4 = arith.constant 0 : index
    %c0_5 = arith.constant 0 : index
    %6 = vector.load %arg5[%c0_4, %c0_5] : memref<1x128xf32, #tpu.memory_space<vmem>>, vector<1x128xf32>
    %cst_6 = arith.constant dense<0.000000e+00> : vector<128xf32>
    %7 = vector.multi_reduction <add>, %5, %cst_6 [0] : vector<128x128xf32> to vector<128xf32>
    %8 = vector.shape_cast %7 : vector<128xf32> to vector<1x128xf32>
    %9 = arith.addf %6, %8 : vector<1x128xf32>
    %c0_7 = arith.constant 0 : index
    %c0_8 = arith.constant 0 : index
    %10 = vector.load %arg5[%c0_7, %c0_8] : memref<1x128xf32, #tpu.memory_space<vmem>>, vector<1x128xf32>
    tpu.vector_store %arg5[%c0_7, %c0_8], %9 {strides = array<i32>} : memref<1x128xf32, #tpu.memory_space<vmem>>, vector<1x128xf32>,
    %c0_9 = arith.constant 0 : index
    %c0_10 = arith.constant 0 : index
    %11 = vector.load %arg6[%c0_9, %c0_10] : memref<1x128xf32, #tpu.memory_space<vmem>>, vector<1x128xf32>
    %12 = arith.mulf %5, %5 : vector<128x128xf32>
    %cst_11 = arith.constant dense<0.000000e+00> : vector<128xf32>
    %13 = vector.multi_reduction <add>, %12, %cst_11 [0] : vector<128x128xf32> to vector<128xf32>
    %14 = vector.shape_cast %13 : vector<128xf32> to vector<1x128xf32>
    %15 = arith.addf %11, %14 : vector<1x128xf32>
    %c0_12 = arith.constant 0 : index
    %c0_13 = arith.constant 0 : index
    %16 = vector.load %arg6[%c0_12, %c0_13] : memref<1x128xf32, #tpu.memory_space<vmem>>, vector<1x128xf32>
    tpu.vector_store %arg6[%c0_12, %c0_13], %15 {strides = array<i32>} : memref<1x128xf32, #tpu.memory_space<vmem>>, vector<1x128xf32>,
    %c0_i32_14 = arith.constant 0 : i32
    %17 = arith.cmpi eq, %arg0, %c0_i32_14 : i32
    %18 = arith.extui %17 : i1 to i32
    %c0_i32_15 = arith.constant 0 : i32
    %19 = arith.cmpi ne, %18, %c0_i32_15 : i32
    scf.if %19 {
      %c0_16 = arith.constant 0 : index
      %c0_17 = arith.constant 0 : index
      %20 = vector.load %arg5[%c0_16, %c0_17] : memref<1x128xf32, #tpu.memory_space<vmem>>, vector<1x128xf32>
      %cst_18 = arith.constant 1.562500e-02 : f32
      %21 = vector.broadcast %cst_18 : f32 to vector<1x128xf32>
      %22 = arith.mulf %20, %21 : vector<1x128xf32>
      %c0_19 = arith.constant 0 : index
      %c0_20 = arith.constant 0 : index
      %23 = vector.load %arg6[%c0_19, %c0_20] : memref<1x128xf32, #tpu.memory_space<vmem>>, vector<1x128xf32>
      %cst_21 = arith.constant 1.562500e-02 : f32
      %24 = vector.broadcast %cst_21 : f32 to vector<1x128xf32>
      %25 = arith.mulf %23, %24 : vector<1x128xf32>
      %26 = arith.mulf %22, %22 : vector<1x128xf32>
      %27 = arith.subf %25, %26 : vector<1x128xf32>
      %cst_22 = arith.constant 0.000000e+00 : f32
      %28 = vector.broadcast %cst_22 : f32 to vector<1x128xf32>
      %29 = arith.maximumf %27, %28 : vector<1x128xf32>
      %c0_23 = arith.constant 0 : index
      %c0_24 = arith.constant 0 : index
      %30 = vector.load %arg3[%c0_23, %c0_24] : memref<1x128xf32, #tpu.memory_space<vmem>>, vector<1x128xf32>
      tpu.vector_store %arg3[%c0_23, %c0_24], %22 {strides = array<i32>} : memref<1x128xf32, #tpu.memory_space<vmem>>, vector<1x128xf32>,
      %cst_25 = arith.constant 9.99999974E-6 : f32
      %31 = vector.broadcast %cst_25 : f32 to vector<1x128xf32>
      %32 = arith.addf %29, %31 : vector<1x128xf32>
      %33 = math.rsqrt %32 : vector<1x128xf32>
      %c0_26 = arith.constant 0 : index
      %c0_27 = arith.constant 0 : index
      %34 = vector.load %arg4[%c0_26, %c0_27] : memref<1x128xf32, #tpu.memory_space<vmem>>, vector<1x128xf32>
      tpu.vector_store %arg4[%c0_26, %c0_27], %33 {strides = array<i32>} : memref<1x128xf32, #tpu.memory_space<vmem>>, vector<1x128xf32>,
    } else {
    }
    return
  }
  func.func @transform_0(%arg0: i32) -> (i32, i32) {
    %c0_i32 = arith.constant 0 : i32
    %c0_i32_0 = arith.constant 0 : i32
    return %arg0, %c0_i32 : i32, i32
  }
  func.func @transform_1(%arg0: i32) -> (i32, i32) {
    %c0_i32 = arith.constant 0 : i32
    %c0_i32_0 = arith.constant 0 : i32
    %c0_i32_1 = arith.constant 0 : i32
    return %c0_i32, %c0_i32_0 : i32, i32
  }
  func.func @transform_2(%arg0: i32) -> (i32, i32) {
    %c0_i32 = arith.constant 0 : i32
    %c0_i32_0 = arith.constant 0 : i32
    %c0_i32_1 = arith.constant 0 : i32
    return %c0_i32, %c0_i32_0 : i32, i32
  }
  func.func @transform_3(%arg0: i32) -> (i32, i32) {
    %c0_i32 = arith.constant 0 : i32
    %c0_i32_0 = arith.constant 0 : i32
    %c0_i32_1 = arith.constant 0 : i32
    return %c0_i32, %c0_i32_0 : i32, i32
  }
}

</mosaic_0001>

<bundles_post_ra>
// kernel: tpu_custom_call.1
= control target key start
LH: loop header
LB: loop body
LE: loop exit
PB: predicated region body
PF: predicated region fallthrough
CT: control target
= control target key end

     0   :  { %9 = vsyncpa [#allocation5], 0  ;;  %s659_s0 = inlined_call_operand.hbm [shape: bf16[128,128], index: 0, kind: input, shape index: {}]   ;;  %s660_s1 = inlined_call_operand.hbm [shape: bf16[128,128], index: 1, kind: input, shape index: {}]   ;;  %s661_s2 = inlined_call_operand.hbm [shape: f32[1,128], index: 2, kind: output, shape index: {0}]   ;;  %s662_s3 = inlined_call_operand.hbm [shape: f32[1,128], index: 3, kind: output, shape index: {1}]  }
   0x1   :  { %10 = vsyncpa [#allocation8], 0 }
   0x2   :  { %11 = vsyncpa [#allocation6], 0 }
   0x3   :  { %12 = vsyncpa [#allocation11], 0  ;;  %s584_s12 = smov [#allocation4]   ;;  %s488_s16 = scalar_lea.hbm %s659_s0, 1024 }
   0x4   :  { %s18_s13 = sshll.u32 %s584_s12, 4  ;;  %p489_p0 = scmp.ne.s32.totalorder %s659_s0, %s488_s16  ;;  %s19_s13 = int_to_ptr.vmem [resolvable:$true] %s18_s13 }
   0x5   :  { %p492_p1 = scmp.lt.u32.totalorder %s488_s16, %s659_s0 }
   0x7   :  { %p494_p2 = pnand %p492_p1, %p489_p0 }
   0x9   :  { %497 = shalt.err (!%p494_p2)
}
   0xa   :  { %s498_s21 = scalar_lea.vmem %s19_s13, 1024  ;;  %p503_p4 = scmp.lt.s32.totalorder %s19_s13, %s19_s13 }
   0xb   :  { %p499_p3 = scmp.ne.s32.totalorder %s19_s13, %s498_s21  ;;  %p504_p5 = scmp.lt.s32.totalorder %s498_s21, %s498_s21 }
   0xd   :  { %p505_p6 = por %p504_p5, %p503_p4 }
   0xf   :  { %p506_p7 = pnand %p505_p6, %p499_p3 }
  0x11   :  { %509 = shalt.err (!%p506_p7)
}
  0x12   :  { %s585_s22 = smov 64   ;;  %s586_s23 = smov 4  }
  0x13   :  { %24 = dma.hbm_to_vmem [thread:$0]  %s659_s0, 1024, %s19_s13, [#allocation5], %s585_s22, %s585_s22, %s586_s23  }
  0x14   :  { %s587_s26 = smov [#allocation7]   ;;  %s510_s30 = scalar_lea.hbm %s660_s1, 1024 }
  0x15   :  { %s30_s27 = sshll.u32 %s587_s26, 4  ;;  %p511_p8 = scmp.ne.s32.totalorder %s660_s1, %s510_s30  ;;  %s31_s27 = int_to_ptr.vmem [resolvable:$true] %s30_s27 }
  0x16   :  { %p514_p9 = scmp.lt.u32.totalorder %s510_s30, %s660_s1 }
  0x18   :  { %p516_p10 = pnand %p514_p9, %p511_p8 }
  0x1a   :  { %519 = shalt.err (!%p516_p10)
}
  0x1b   :  { %s520_s8 = scalar_lea.vmem %s31_s27, 1024  ;;  %p525_p12 = scmp.lt.s32.totalorder %s31_s27, %s31_s27 }
  0x1c   :  { %p521_p11 = scmp.ne.s32.totalorder %s31_s27, %s520_s8  ;;  %p526_p13 = scmp.lt.s32.totalorder %s520_s8, %s520_s8 }
  0x1e   :  { %p527_p0 = por %p526_p13, %p525_p12 }
  0x20   :  { %p528_p1 = pnand %p527_p0, %p521_p11 }
  0x22   :  { %531 = shalt.err (!%p528_p1)
}
  0x23   :  { %36 = dma.hbm_to_vmem [thread:$0]  %s660_s1, 1024, %s31_s27, [#allocation8], %s585_s22, %s585_s22, %s586_s23  }
  0x24   :  { %576 = dma.done.wait [#allocation5], 1024  }
  0x25   :  { %577 = vsyncadd [#allocation5], 4294966272 }
  0x26   :  { %578 = dma.done.wait [#allocation8], 1024  }
  0x27   :  { %579 = vsyncadd [#allocation8], 4294966272  ;;  %v470_v0 = vld [vmem:[#allocation7] sm:$0xff]   ;;  %v471_v1 = vld [vmem:[#allocation7 + $0x8] sm:$0xff]   ;;  %v588_v16 = vmov 0.0   ;;  %s589_s1 = smov [#allocation9]  }
  0x28   :  { %415 = vmatprep.subr.bf16.mxu0 %v470_v0  ;;  %447 = vmatprep.subr.bf16.mxu1 %v470_v0  ;;  %v472_v2 = vld [vmem:[#allocation7 + $0x10] sm:$0xff]   ;;  %v473_v3 = vld [vmem:[#allocation7 + $0x18] sm:$0xff]   ;;  %v478_v4 = vld [vmem:[#allocation4] sm:$0xff]   ;;  %48 = vst [vmem:[#allocation2] sm:$0x1] %v588_v16  ;;  %s359_s10 = sshll.u32 %s589_s1, 4  ;;  %s360_s10 = int_to_ptr.vmem [resolvable:$true] %s359_s10 }
  0x29   :  { %416 = vmatpush3.bf16.msra.mxu0 %v470_v0  ;;  %455 = vmatpush3.bf16.msra.mxu1 %v470_v0  ;;  %v474_v5 = vld [vmem:[#allocation7 + $0x20] sm:$0xff]   ;;  %v475_v7 = vld [vmem:[#allocation7 + $0x28] sm:$0xff]   ;;  %v476_v8 = vld [vmem:[#allocation7 + $0x30] sm:$0xff]   ;;  %49 = vst [vmem:[#allocation3] sm:$0x1] %v588_v16  ;;  %s532_s11 = scalar_lea.vmem %s360_s10, 16  ;;  %p537_p3 = scmp.lt.s32.totalorder %s360_s10, %s360_s10 }
  0x2a   :  { %417 = vmatprep.subr.bf16.mxu0 %v471_v1  ;;  %448 = vmatprep.subr.bf16.mxu1 %v471_v1  ;;  %v482_v6 = vld [vmem:[#allocation4 + $0x20] sm:$0xff]   ;;  %v477_v9 = vld [vmem:[#allocation7 + $0x38] sm:$0xff]   ;;  %v479_v10 = vld [vmem:[#allocation4 + $0x8] sm:$0xff]   ;;  %p533_p2 = scmp.ne.s32.totalorder %s360_s10, %s532_s11  ;;  %s536_s12 = scalar_lea.vmem %s360_s10, 32 }
  0x2b   :  { %431 = vmatprep.mubr.bf16.mxu0 %v478_v4  ;;  %439 = vmatprep.mubr.bf16.mxu1 %v482_v6  ;;  %v483_v11 = vld [vmem:[#allocation4 + $0x28] sm:$0xff]   ;;  %v480_v12 = vld [vmem:[#allocation4 + $0x10] sm:$0xff]   ;;  %v481_v14 = vld [vmem:[#allocation4 + $0x18] sm:$0xff]   ;;  %p538_p4 = scmp.lt.s32.totalorder %s536_s12, %s532_s11 }
  0x2c   :  { %v484_v13 = vld [vmem:[#allocation4 + $0x30] sm:$0xff]   ;;  %v485_v15 = vld [vmem:[#allocation4 + $0x38] sm:$0xff]  }
  0x2d   :  { %418 = vmatpush3.bf16.msra.mxu0 %v471_v1  ;;  %456 = vmatpush3.bf16.msra.mxu1 %v471_v1  ;;  %p539_p5 = por %p538_p4, %p537_p3 }
  0x2e   :  { %419 = vmatprep.subr.bf16.mxu0 %v472_v2  ;;  %449 = vmatprep.subr.bf16.mxu1 %v472_v2 }
  0x2f   :  { %p540_p6 = pnand %p539_p5, %p533_p2 }
  0x31   :  { %420 = vmatpush3.bf16.msra.mxu0 %v472_v2  ;;  %457 = vmatpush3.bf16.msra.mxu1 %v472_v2 }
  0x32   :  { %421 = vmatprep.subr.bf16.mxu0 %v473_v3  ;;  %450 = vmatprep.subr.bf16.mxu1 %v473_v3 }
  0x35   :  { %422 = vmatpush3.bf16.msra.mxu0 %v473_v3  ;;  %458 = vmatpush3.bf16.msra.mxu1 %v473_v3 }
  0x36   :  { %423 = vmatprep.subr.bf16.mxu0 %v474_v5  ;;  %451 = vmatprep.subr.bf16.mxu1 %v474_v5 }
  0x39   :  { %424 = vmatpush3.bf16.msra.mxu0 %v474_v5  ;;  %459 = vmatpush3.bf16.msra.mxu1 %v474_v5 }
  0x3a   :  { %425 = vmatprep.subr.bf16.mxu0 %v475_v7  ;;  %452 = vmatprep.subr.bf16.mxu1 %v475_v7 }
  0x3d   :  { %426 = vmatpush3.bf16.msra.mxu0 %v475_v7  ;;  %460 = vmatpush3.bf16.msra.mxu1 %v475_v7 }
  0x3e   :  { %427 = vmatprep.subr.bf16.mxu0 %v476_v8  ;;  %453 = vmatprep.subr.bf16.mxu1 %v476_v8 }
  0x41   :  { %428 = vmatpush3.bf16.msra.mxu0 %v476_v8  ;;  %461 = vmatpush3.bf16.msra.mxu1 %v476_v8 }
  0x42   :  { %429 = vmatprep.subr.bf16.mxu0 %v477_v9  ;;  %454 = vmatprep.subr.bf16.mxu1 %v477_v9 }
  0x45   :  { %430 = vmatpush3.bf16.msra.mxu0 %v477_v9  ;;  %462 = vmatpush3.bf16.msra.mxu1 %v477_v9 }
  0x48   :  { %432 = vmatmul.mubr.bf16.vlgmr.msra.gmra.mrb[0].mxu0 %v479_v10  ;;  %440 = vmatmul.mubr.bf16.vlgmr.msra.gmra.mrb[0].mxu1 %v483_v11 }
  0x49   :  { %435 = vmatprep.mubr.bf16.mxu0 %v480_v12  ;;  %443 = vmatprep.mubr.bf16.mxu1 %v484_v13 }
  0x50   :  { %436 = vmatmul.mubr.bf16.gmra.mrb[4].mxu0 %v481_v14  ;;  %444 = vmatmul.mubr.bf16.gmra.mrb[4].mxu1 %v485_v15 }
 0x11b   :  { %v433_v17 = vpop.f32.mrb[0].mxu0  ;;  %v441_v18 = vpop.f32.mrb[0].mxu1 }
 0x11c   :  { %v212_v19 = vpop.f32.mrb[1].mxu0  ;;  %v244_v20 = vpop.f32.mrb[1].mxu1  ;;  %v302_v28 = vmul.f32 %v433_v17, %v433_v17  ;;  %v310_v60 = vmul.f32 %v441_v18, %v441_v18 }
 0x11d   :  { %v434_v21 = vpop.f32.mrb[2].mxu0  ;;  %v442_v22 = vpop.f32.mrb[2].mxu1  ;;  %v300_v25 = vmul.f32 %v212_v19, %v212_v19  ;;  %v308_v54 = vmul.f32 %v244_v20, %v244_v20 }
 0x11e   :  { %v215_v23 = vpop.f32.mrb[3].mxu0  ;;  %v247_v24 = vpop.f32.mrb[3].mxu1  ;;  %v303_v31 = vmul.f32 %v434_v21, %v434_v21  ;;  %v311_v63 = vmul.f32 %v442_v22, %v442_v22 }
 0x11f   :  { %v276_v26 = vadd.f32 %v215_v23, %v212_v19  ;;  %v301_v27 = vmul.f32 %v215_v23, %v215_v23  ;;  %v309_v59 = vmul.f32 %v247_v24, %v247_v24 }
 0x121   :  { %v277_v29 = vadd.f32 %v433_v17, %v276_v26  ;;  %v316_v30 = vadd.f32 %v301_v27, %v300_v25  ;;  %v299_v27 = vld [vmem:[#allocation3] sm:$0x1] }
 0x123   :  { %v317_v32 = vadd.f32 %v316_v30, %v302_v28  ;;  %v437_v33 = vpop.f32.mrb[4].mxu0  ;;  %v278_v34 = vadd.f32 %v434_v21, %v277_v29  ;;  %v445_v35 = vpop.f32.mrb[4].mxu1 }
 0x124   :  { %v228_v36 = vpop.f32.mrb[5].mxu0  ;;  %v260_v37 = vpop.f32.mrb[5].mxu1  ;;  %v306_v48 = vmul.f32 %v437_v33, %v437_v33  ;;  %v314_v8 = vmul.f32 %v445_v35, %v445_v35 }
 0x125   :  { %v279_v38 = vadd.f32 %v278_v34, %v228_v36  ;;  %v304_v39 = vmul.f32 %v228_v36, %v228_v36  ;;  %v318_v40 = vadd.f32 %v317_v32, %v303_v31  ;;  %v438_v41 = vpop.f32.mrb[6].mxu0  ;;  %v446_v42 = vpop.f32.mrb[6].mxu1  ;;  %v312_v2 = vmul.f32 %v260_v37, %v260_v37 }
 0x126   :  { %v231_v43 = vpop.f32.mrb[7].mxu0  ;;  %v263_v44 = vpop.f32.mrb[7].mxu1  ;;  %v307_v51 = vmul.f32 %v438_v41, %v438_v41  ;;  %v315_v11 = vmul.f32 %v446_v42, %v446_v42 }
 0x127   :  { %v319_v45 = vadd.f32 %v318_v40, %v304_v39  ;;  %v280_v46 = vadd.f32 %v279_v38, %v231_v43  ;;  %v305_v47 = vmul.f32 %v231_v43, %v231_v43  ;;  %v313_v7 = vmul.f32 %v263_v44, %v263_v44 }
 0x129   :  { %v281_v49 = vadd.f32 %v437_v33, %v280_v46  ;;  %v320_v50 = vadd.f32 %v319_v45, %v305_v47 }
 0x12b   :  { %v321_v52 = vadd.f32 %v320_v50, %v306_v48  ;;  %v282_v53 = vadd.f32 %v438_v41, %v281_v49 }
 0x12d   :  { %v283_v55 = vadd.f32 %v282_v53, %v244_v20  ;;  %v322_v56 = vadd.f32 %v321_v52, %v307_v51 }
 0x12f   :  { %v323_v57 = vadd.f32 %v322_v56, %v308_v54  ;;  %v284_v58 = vadd.f32 %v283_v55, %v247_v24  ;;  %v275_v24 = vld [vmem:[#allocation2] sm:$0x1] }
 0x131   :  { %v285_v61 = vadd.f32 %v441_v18, %v284_v58  ;;  %v324_v62 = vadd.f32 %v323_v57, %v309_v59 }
 0x133   :  { %v325_v0 = vadd.f32 %v324_v62, %v310_v60  ;;  %v286_v1 = vadd.f32 %v442_v22, %v285_v61 }
 0x135   :  { %v287_v3 = vadd.f32 %v286_v1, %v260_v37  ;;  %v326_v4 = vadd.f32 %v325_v0, %v311_v63 }
 0x137   :  { %v327_v5 = vadd.f32 %v326_v4, %v312_v2  ;;  %v288_v6 = vadd.f32 %v287_v3, %v263_v44 }
 0x139   :  { %v289_v9 = vadd.f32 %v445_v35, %v288_v6  ;;  %v328_v10 = vadd.f32 %v327_v5, %v313_v7 }
 0x13b   :  { %v290_v12 = vadd.f32 %v446_v42, %v289_v9  ;;  %v329_v13 = vadd.f32 %v328_v10, %v314_v8 }
 0x13d   :  { %v291_v14 = vrot.slane %v290_v12, 4  ;;  %v330_v15 = vadd.f32 %v329_v13, %v315_v11 }
 0x13f   :  { %v292_v16 = vadd.f32 %v291_v14, %v290_v12  ;;  %v331_v17 = vrot.slane %v330_v15, 4 }
 0x141   :  { %v293_v18 = vrot.slane %v292_v16, 2  ;;  %v332_v19 = vadd.f32 %v331_v17, %v330_v15 }
 0x143   :  { %v294_v20 = vadd.f32 %v293_v18, %v292_v16  ;;  %v333_v21 = vrot.slane %v332_v19, 2 }
 0x145   :  { %v295_v22 = vrot.slane %v294_v20, 1  ;;  %v334_v23 = vadd.f32 %v333_v21, %v332_v19 }
 0x147   :  { %v296_v25 = vadd.f32 %v295_v22, %v294_v20  ;;  %v335_v26 = vrot.slane %v334_v23, 1 }
 0x149   :  { %v297_v28 = vadd.f32 %v296_v25, %v275_v24  ;;  %v336_v29 = vadd.f32 %v335_v26, %v334_v23 }
 0x14b   :  { %298 = vst [vmem:[#allocation2] sm:$0x1] %v297_v28  ;;  %v337_v30 = vadd.f32 %v336_v29, %v299_v27 }
 0x14d   :  { %338 = vst [vmem:[#allocation3] sm:$0x1] %v337_v30 }
 0x152   :  { %v342_v31 = vld [vmem:[#allocation2] sm:$0x1] }
 0x153   :  { %v343_v32 = vmul.f32 0.015625, %v342_v31 }
 0x154   :  { %v344_v33 = vld [vmem:[#allocation3] sm:$0x1] }
 0x155   :  { %v345_v34 = vmul.f32 0.015625, %v344_v33  ;;  %v346_v35 = vmul.f32 %v343_v32, %v343_v32  ;;  %349 = vst [vmem:[#allocation9] sm:$0x1] %v343_v32 }
 0x156   :  { %543 = shalt.err (!%p540_p6)
}
 0x157   :  { %s544_s15 = scalar_lea.hbm %s661_s2, 16 }
 0x158   :  { %p545_p7 = scmp.ne.s32.totalorder %s661_s2, %s544_s15  ;;  %p548_p8 = scmp.lt.u32.totalorder %s544_s15, %s661_s2 }
 0x15a   :  { %p550_p9 = pnand %p548_p8, %p545_p7 }
 0x15c   :  { %553 = shalt.err (!%p550_p9)
}
 0x15d   :  { %362 = dma.vmem_to_hbm [thread:$0]  %s360_s10, 16, %s661_s2, [#allocation6]   ;;  %v347_v36 = vsub.f32 %v345_v34, %v346_v35 }
 0x15e   :  { %s590_s22 = smov [#allocation10]  }
 0x15f   :  { %v348_v37 = vmax.f32 %v347_v36, 0.0  ;;  %s369_s23 = sshll.u32 %s590_s22, 4  ;;  %s370_s23 = int_to_ptr.vmem [resolvable:$true] %s369_s23 }
 0x160   :  { %s554_s24 = scalar_lea.vmem %s370_s23, 16  ;;  %s558_s25 = scalar_lea.vmem %s370_s23, 32 }
 0x161   :  { %v350_v38 = vadd.f32 1e-05, %v348_v37  ;;  %p555_p10 = scmp.ne.s32.totalorder %s370_s23, %s554_s24  ;;  %p559_p11 = scmp.lt.s32.totalorder %s370_s23, %s370_s23 }
 0x162   :  { %p560_p12 = scmp.lt.s32.totalorder %s558_s25, %s554_s24 }
 0x163   :  { %486 = vrsqrt.f32 %v350_v38 }
 0x164   :  { %p561_p13 = por %p560_p12, %p559_p11 }
 0x166   :  { %p562_p0 = pnand %p561_p13, %p555_p10 }
 0x16d   :  { %v487_v39 = vpop.eup %486 }
 0x16e   :  { %352 = vst [vmem:[#allocation10] sm:$0x1] %v487_v39 }
 0x16f   :  { %565 = shalt.err (!%p562_p0)
}
 0x170   :  { %s566_s2 = scalar_lea.hbm %s662_s3, 16 }
 0x171   :  { %p567_p1 = scmp.ne.s32.totalorder %s662_s3, %s566_s2  ;;  %p570_p2 = scmp.lt.u32.totalorder %s566_s2, %s662_s3 }
 0x173   :  { %p572_p3 = pnand %p570_p2, %p567_p1 }
 0x175   :  { %575 = shalt.err (!%p572_p3)
}
 0x176   :  { %372 = dma.vmem_to_hbm [thread:$0]  %s370_s23, 16, %s662_s3, [#allocation11]  }
 0x177   :  { %580 = dma.done.wait [#allocation6], 16  }
 0x178   :  { %581 = vsyncadd [#allocation6], 4294967280 }
 0x179   :  { %582 = dma.done.wait [#allocation11], 16  }
 0x17a   :  { %583 = vsyncadd [#allocation11], 4294967280 }
 0x17b   :  { %379 = vsyncpa [#allocation5], 1 }
 0x17c   :  { %380 = vsyncpa [#allocation8], 1 }
 0x17d   :  { %381 = vsyncpa [#allocation6], 1 }
 0x17e   :  { %382 = vsyncpa [#allocation11], 1 }

</bundles_post_ra>
